<compile_context>
chip_gen: v7x
topology: tpu7x:2x2x1
jax: 0.10.0
libtpu: 0.0.40
codegen_flags: <defaults>
</compile_context>

<pallas_src>
import functools
import math

import jax
import jax.numpy as jnp
import numpy as np
from jax import lax
from jax.experimental import pallas as pl
from jax.experimental.pallas import tpu as pltpu

_LOG_2PI = math.log(2.0 * math.pi)


def _ssq_kernel(z_ref, out_ref, *, lane_tile):
    """Accumulate sum(z*z) for one partition into a resident (1,8,128) out block."""
    j = pl.program_id(1)

    @pl.when(j == 0)
    def _():
        out_ref[...] = jnp.zeros_like(out_ref)

    num_chunks = lane_tile // 128

    def body(c, s):
        off = pl.multiple_of(c * 128, 128)
        zt = z_ref[:, pl.ds(off, 128)]        # one (8,128) vreg from VMEM
        return s + zt * zt                    # VALU only; constants hoisted out

    s = lax.fori_loop(
        0, num_chunks, body,
        jnp.zeros((8, 128), jnp.float32),
        unroll=min(8, num_chunks),
    )
    out_ref[...] += s[None]


def real_nvp_loss(z, sldj, k=256, *, lane_tile=131072, num_partitions=2):
    """NLL matching RealNVPLoss.forward(z, sldj)."""
    B = z.shape[0]
    D = int(np.prod(z.shape[1:]))
    total = B * D
    rows = num_partitions * 8
    per_row = -(-total // rows)               # unpadded elements per sublane row

    # Adaptive lane tile: keep padding small and DMA blocks large.
    lt = lane_tile
    while lt > 512 and lt * 8 > per_row:      # <= ~12.5% padding when data is big
        lt //= 2
    while lt > 128 and lt > per_row:          # tiny inputs: avoid gross padding
        lt //= 2

    L = -(-per_row // lt) * lt                # lanes per row, multiple of lt
    padded = rows * L

    flat = z.reshape(-1).astype(jnp.float32)
    if padded != total:
        flat = jnp.pad(flat, (0, padded - total))   # zeros don't affect sum(z^2)
    z2d = flat.reshape(rows, L)

    grid = (num_partitions, L // lt)

    partials = pl.pallas_call(
        functools.partial(_ssq_kernel, lane_tile=lt),
        out_shape=jax.ShapeDtypeStruct((num_partitions, 8, 128), jnp.float32),
        grid_spec=pltpu.PrefetchScalarGridSpec(
            num_scalar_prefetch=0,
            grid=grid,
            in_specs=[pl.BlockSpec((8, lt), lambda p, j: (p, j))],
            out_specs=pl.BlockSpec((1, 8, 128), lambda p, j: (p, 0, 0)),
        ),
        compiler_params=pltpu.CompilerParams(
            dimension_semantics=("parallel", "arbitrary"),
            vmem_limit_bytes=32 * 1024 * 1024,
        ),
    )(z2d)

    total_ssq = jnp.sum(partials)
    const = (0.5 * _LOG_2PI + math.log(k)) * D
    nll = 0.5 * total_ssq / B + const - jnp.mean(sldj.astype(jnp.float32))
    return nll


def _reference(z, sldj, k=256):
    # pure-JAX reference mirroring the PyTorch module
    prior_ll = -0.5 * (z ** 2 + np.log(2 * np.pi))
    prior_ll = prior_ll.reshape(z.shape[0], -1).sum(-1) - np.log(k) * np.prod(
        z.shape[1:]
    )
    ll = prior_ll + sldj
    return -ll.mean()


if __name__ == "__main__":
    key = jax.random.PRNGKey(0)
    kz, ks = jax.random.split(key)
    # Small shapes consistent with a RealNVP latent: NCHW (B=2, C=4, H=16, W=16)
    z = jax.random.normal(kz, (2, 4, 16, 16), dtype=jnp.float32)
    sldj = jax.random.normal(ks, (2,), dtype=jnp.float32)

    nll = jax.block_until_ready(real_nvp_loss(z, sldj, k=256))
    ref = jax.block_until_ready(_reference(z, sldj, k=256))

    assert jnp.allclose(nll, ref, rtol=1e-5, atol=1e-3), (nll, ref)
    print("KERNEL_OK")
</pallas_src>

<mosaic_0001>
module attributes {stable_mosaic.version = 11 : i64} {
  func.func @_ssq_kernel(%arg0: i32, %arg1: i32, %arg2: memref<8x128xf32, #tpu.memory_space<vmem>>, %arg3: memref<1x8x128xf32, #tpu.memory_space<vmem>>) attributes {dimension_semantics = [#tpu.dimension_semantics<parallel>, #tpu.dimension_semantics<arbitrary>], iteration_bounds = array<i64: 2, 1>, scalar_prefetch = 0 : i64, scratch_operands = 0 : i64, tpu.core_type = #tpu.core_type<tc>, window_params = [{transform_indices = @transform_0, window_bounds = array<i64: 8, 128>}, {transform_indices = @transform_1, window_bounds = array<i64: 1, 8, 128>}]} {
    %c0_i32 = arith.constant 0 : i32
    %0 = arith.cmpi eq, %arg1, %c0_i32 : i32
    %1 = arith.extui %0 : i1 to i32
    %c0_i32_0 = arith.constant 0 : i32
    %2 = arith.cmpi ne, %1, %c0_i32_0 : i32
    scf.if %2 {
      %cst_8 = arith.constant 0.000000e+00 : f32
      %14 = vector.broadcast %cst_8 : f32 to vector<1x8x128xf32>
      %c0_9 = arith.constant 0 : index
      %c0_10 = arith.constant 0 : index
      %c0_11 = arith.constant 0 : index
      %15 = vector.load %arg3[%c0_9, %c0_10, %c0_11] : memref<1x8x128xf32, #tpu.memory_space<vmem>>, vector<1x8x128xf32>
      tpu.vector_store %arg3[%c0_9, %c0_10, %c0_11], %14 {strides = array<i32>} : memref<1x8x128xf32, #tpu.memory_space<vmem>>, vector<1x8x128xf32>,
    } else {
    }
    %cst = arith.constant 0.000000e+00 : f32
    %3 = vector.broadcast %cst : f32 to vector<8x128xf32>
    %c0_i32_1 = arith.constant 0 : i32
    %c128_i32 = arith.constant 128 : i32
    %4 = arith.muli %c0_i32_1, %c128_i32 : i32
    %5 = tpu.assume_multiple %4, 128 : i32
    %c0 = arith.constant 0 : index
    %6 = arith.index_cast %5 : i32 to index
    %7 = vector.load %arg2[%c0, %6] : memref<8x128xf32, #tpu.memory_space<vmem>>, vector<8x128xf32>
    %8 = arith.mulf %7, %7 : vector<8x128xf32>
    %9 = arith.addf %3, %8 : vector<8x128xf32>
    %c1_i32 = arith.constant 1 : i32
    %c0_2 = arith.constant 0 : index
    %c0_3 = arith.constant 0 : index
    %c0_4 = arith.constant 0 : index
    %10 = vector.load %arg3[%c0_2, %c0_3, %c0_4] : memref<1x8x128xf32, #tpu.memory_space<vmem>>, vector<1x8x128xf32>
    %11 = vector.shape_cast %9 : vector<8x128xf32> to vector<1x8x128xf32>
    %12 = arith.addf %10, %11 : vector<1x8x128xf32>
    %c0_5 = arith.constant 0 : index
    %c0_6 = arith.constant 0 : index
    %c0_7 = arith.constant 0 : index
    %13 = vector.load %arg3[%c0_5, %c0_6, %c0_7] : memref<1x8x128xf32, #tpu.memory_space<vmem>>, vector<1x8x128xf32>
    tpu.vector_store %arg3[%c0_5, %c0_6, %c0_7], %12 {strides = array<i32>} : memref<1x8x128xf32, #tpu.memory_space<vmem>>, vector<1x8x128xf32>,
    return
  }
  func.func @transform_0(%arg0: i32, %arg1: i32) -> (i32, i32) {
    %c0_i32 = arith.constant 0 : i32
    return %arg0, %arg1 : i32, i32
  }
  func.func @transform_1(%arg0: i32, %arg1: i32) -> (i32, i32, i32) {
    %c0_i32 = arith.constant 0 : i32
    %c0_i32_0 = arith.constant 0 : i32
    %c0_i32_1 = arith.constant 0 : i32
    return %arg0, %c0_i32, %c0_i32_0 : i32, i32, i32
  }
}

</mosaic_0001>

<bundles_post_ra>
// kernel: tpu_custom_call.1
= control target key start
LH: loop header
LB: loop body
LE: loop exit
PB: predicated region body
PF: predicated region fallthrough
CT: control target
= control target key end

     0   :  { %6 = vsyncpa [#allocation3], 0  ;;  %s625_s0 = inlined_call_operand.hbm [shape: f32[16,128], index: 0, kind: input, shape index: {}]   ;;  %s626_s1 = inlined_call_operand.hbm [shape: f32[2,8,128], index: 1, kind: output, shape index: {}]  }
   0x1   :  { %8 = vsyncpa [#allocation3 + $0x1], 0 }
   0x2   :  { %9 = vsyncpa [#allocation4], 0 }
   0x3   :  { %11 = vsyncpa [#allocation4 + $0x1], 0  ;;  %s453_s6 = smov 0   ;;  %s455_s7 = smov 0  }
   0x4   :  { %s457_s8 = smov 0   ;;  %s459_s9 = smov 0  }
   0x5   :  { %s461_s10 = smov 0   ;;  %s463_s11 = smov 0  }
   0x6 LB: > { %s251_s12 = sadd.s32 4294967295, %s439_s11   ;;  %s252_s13 = sadd.s32 4294967294, %s439_s11   ;;  %s439_s11 = sphi %s463_s11, %s17_s11   ;;  %s435_s10 = sphi %s461_s10, %s642_s10   ;;  %s431_s9 = sphi %s459_s9, %s641_s9   ;;  %s427_s8 = sphi %s457_s8, %s640_s8   ;;  %s423_s7 = sphi %s455_s7, %s639_s7   ;;  %s419_s6 = sphi %s453_s6, %s638_s6  }
   0x7   : > { %s29_s14 = sadd.s32 1, %s435_s10  ;;  %s38_s15 = sadd.s32 1, %s427_s8 }
   0x8   : > { %p31_p0 = scmp.ge.s32.totalorder %s29_s14, 2  ;;  %p45_p1 = scmp.ne.s32.totalorder %s427_s8, %s423_s7 }
   0x9   : > { %p46_p2 = scmp.eq.s32.totalorder %s439_s11, 0  ;;  %p51_p3 = scmp.ne.s32.totalorder %s423_s7, %s419_s6 }
   0xa   : > { %s644_s14 = smov (%p31_p0, %s29_s14), 0  ;;  %p52_p5 = scmp.eq.s32.totalorder %s251_s12, 0 }
   0xb   : > { %p494_p4 = por %p46_p2, %p45_p1  ;;  %s33_s17 = ssub.s32 %s435_s10, %s644_s14 }
   0xc   : > { %p75_p6 = scmp.eq.s32.totalorder %s251_s12, 1  ;;  %p36_p7 = scmp.eq.s32.totalorder %s33_s17, 0 }
   0xd   : > { %p500_p8 = por %p52_p5, %p51_p3  ;;  %p81_p10 = scmp.eq.s32.totalorder %s252_s13, 1 }
   0xe   : > { %p504_p9 = por %p75_p6, %p45_p1  ;;  %p276_p13 = scmp.lt.s32.totalorder %s439_s11, 2 }
   0xf   : > { %s509_s20 = scalar_select %p36_p7, %s427_s8, %s38_s15  }
  0x10   : > { %s630_s19 = scalar_select %p504_p9, 1, 0 }
  0x11   : > { %p511_p11 = por %p81_p10, %p51_p3  ;;  %s101_s22 = sand.u32 1, %s427_s8  }
  0x12   : > { %s255_s23 = sshll.u32 %s101_s22, 3  ;;  %s256_s24 = sshll.u32 %s435_s10, 7 }
  0x13   : > { %s631_s21 = scalar_select %p511_p11, 1, 0 }
  0x14   : > { %s522_s27 = scalar_lea.hbm %s625_s0, %s256_s24  ;;  %s105_s28 = scalar_lea.vmem [#allocation2], %s255_s23 }
  0x15   : > { %s113_s29 = sshll.u32 %s105_s28, 4  ;;  %p528_p0 = pnand %p276_p13, %p494_p4  ;;  %s524_s29 = int_to_ptr.vmem [resolvable:$true] %s113_s29 }
  0x16   : > { %s102_s2 = scalar_lea.sflag [#allocation3], %s101_s22  ;;  %s327_s3 = scalar_lea.hbm %s522_s27, 128 }
  0x17   : > { %p328_p3 = scmp.ne.s32.totalorder %s522_s27, %s327_s3  ;;  %p329_p5 = pneg %p528_p0 }
  0x18   : > { %s332_s12 = scalar_lea.hbm %s625_s0, 256  ;;  %p333_p4 = scmp.lt.u32.totalorder %s522_s27, %s625_s0 }
  0x19   : > { %p330_p6 = pnand %p329_p5, %p328_p3  ;;  %p334_p10 = scmp.lt.u32.totalorder %s332_s12, %s327_s3 }
  0x1a   : > { %p336_p12 = scmp.lt.u32.totalorder %s327_s3, %s522_s27 }
  0x1b   : > { %p331_p7 = pneg %p330_p6  ;;  %p335_p13 = por %p334_p10, %p333_p4 }
  0x1d   : > { %p337_p1 = por %p336_p12, %p335_p13 }
  0x1f   : > { %p338_p2 = pnand %p337_p1, %p331_p7 }
  0x21   : > { %341 = shalt.err (!%p338_p2)
}
  0x22   : > { %s342_s16 = scalar_lea.vmem %s524_s29, 128  ;;  %s441_s17 = smov [#allocation2]  }
  0x23   : > { %p343_p3 = scmp.ne.s32.totalorder %s524_s29, %s342_s16  ;;  %s347_s22 = sshll.u32 %s441_s17, 4  ;;  %s348_s22 = int_to_ptr.vmem [resolvable:$false] %s347_s22 }
  0x24   : > { %s349_s23 = scalar_lea.vmem %s348_s22, 256  ;;  %p350_p9 = scmp.lt.s32.totalorder %s524_s29, %s348_s22 }
  0x25   : > { %p345_p6 = pnand %p343_p3, %p329_p5  ;;  %p351_p4 = scmp.lt.s32.totalorder %s349_s23, %s342_s16 }
  0x27   : > { %p346_p11 = pneg %p345_p6  ;;  %p352_p10 = por %p351_p4, %p350_p9 }
  0x29   : > { %p353_p12 = pnand %p352_p10, %p346_p11 }
  0x2b   : > { %356 = shalt.err (!%p353_p12)
}
  0x2c   : > { %271 = dma.hbm_to_vmem [thread:$0]  (!%p528_p0), %s522_s27, 128, %s524_s29, %s102_s2  }
  0x2d   : > { %p633_p1 = scmp.lt.s32.totalorder %s439_s11, 3  ;;  %p634_p2 = scmp.ge.s32.totalorder %s439_s11, 1 }
  0x2f   : > { %p119_p5 = pnand %p634_p2, %p633_p1 }
  0x30   : > { %s564_s24 = sand.u32 (!%p119_p5), 1, %s423_s7  }
  0x31   : > { %122 = sbr.rel (%p119_p5) target bundleno = 83 (0x53), region = 24  ;;  %s258_s25 = sshll.u32 (!%p119_p5), %s564_s24, 3 }
  0x32   : > { %s125_s26 = scalar_lea.sflag (!%p119_p5), [#allocation3], %s564_s24  ;;  %s128_s28 = scalar_lea.vmem (!%p119_p5), [#allocation2], %s258_s25 }
  0x38   : > { %410 = dma.done.wait (%p500_p8), %s125_s26, 128  }
  0x39   : > { %412 = vsyncadd (%p500_p8), %s125_s26, 4294967168  ;;  %v152_v0 = vld [vmem:[%s128_s28] sm:$0xff]  ;;  %s261_s27 = sshll.u32 %s431_s9, 7  ;;  %s146_s29 = scalar_lea.vmem [#allocation5], %s258_s25 }
  0x3a   : > { %s172_s30 = sshll.u32 %s146_s29, 4  ;;  %v153_v1 = vmul.f32 %v152_v0, %v152_v0  ;;  %s576_s4 = scalar_lea.hbm %s626_s1, %s261_s27  ;;  %s578_s30 = int_to_ptr.vmem [resolvable:$true] %s172_s30 }
  0x3b   : > { %s159_s18 = scalar_lea.sflag [#allocation4], %s564_s24  ;;  %s357_s5 = scalar_lea.vmem %s578_s30, 128 }
  0x3c   : > { %157 = vst [vmem:[%s146_s29] sm:$0xff] %v153_v1  ;;  %p358_p8 = scmp.ne.s32.totalorder %s578_s30, %s357_s5  ;;  %p635_p9 = scmp.ne.s32.totalorder %s630_s19, 0 }
  0x3d   : > { %s442_s9 = smov [#allocation5]  }
  0x3e   : > { %p359_p11 = pnand %p358_p8, %p635_p9  ;;  %s361_s12 = sshll.u32 %s442_s9, 4  ;;  %s362_s12 = int_to_ptr.vmem [resolvable:$false] %s361_s12 }
  0x3f   : > { %s363_s13 = scalar_lea.vmem %s362_s12, 256  ;;  %p364_p7 = scmp.lt.s32.totalorder %s578_s30, %s362_s12 }
  0x40   : > { %p360_p0 = pneg %p359_p11  ;;  %p365_p13 = scmp.lt.s32.totalorder %s363_s13, %s357_s5 }
  0x42   : > { %p366_p3 = por %p365_p13, %p364_p7 }
  0x44   : > { %p367_p6 = pnand %p366_p3, %p360_p0 }
  0x46   : > { %370 = shalt.err (!%p367_p6)
}
  0x47   : > { %s371_s15 = scalar_lea.hbm %s576_s4, 128  ;;  %s375_s22 = scalar_lea.hbm %s626_s1, 256 }
  0x48   : > { %p372_p4 = scmp.ne.s32.totalorder %s576_s4, %s371_s15  ;;  %p376_p1 = scmp.lt.u32.totalorder %s576_s4, %s626_s1 }
  0x49   : > { %p377_p2 = scmp.lt.u32.totalorder %s375_s22, %s371_s15  ;;  %p379_p8 = scmp.lt.u32.totalorder %s371_s15, %s576_s4 }
  0x4a   : > { %p373_p10 = pnand %p372_p4, %p635_p9 }
  0x4b   : > { %p378_p5 = por %p377_p2, %p376_p1 }
  0x4c   : > { %p374_p12 = pneg %p373_p10 }
  0x4d   : > { %p380_p11 = por %p379_p8, %p378_p5 }
  0x4f   : > { %p381_p0 = pnand %p380_p11, %p374_p12 }
  0x51   : > { %384 = shalt.err (!%p381_p0)
}
  0x52   : > { %266 = dma.vmem_to_hbm [thread:$0]  (%p635_p9), %s578_s30, 128, %s576_s4, %s159_s18  }
  0x53 PF: > { %s184_s25 = sand.u32 1, %s419_s6   ;;  %p636_p7 = scmp.ne.s32.totalorder %s631_s21, 0 }
  0x54   : > { %p637_p13 = scmp.ge.s32.totalorder %s439_s11, 2  ;;  %s185_s26 = scalar_lea.sflag [#allocation4], %s184_s25 }
  0x56   : > { %p273_p3 = pnand %p637_p13, %p636_p7 }
  0x58   : > { %414 = dma.done.wait (!%p273_p3), %s185_s26, 128  }
  0x59   : > { %416 = vsyncadd (!%p273_p3), %s185_s26, 4294967168  ;;  %s17_s11 = sadd.s32 1, %s439_s11   ;;  %s638_s6 = smov %s423_s7 }
  0x5a   : > { %p14_p6 = scmp.ge.s32.totalorder %s17_s11, 4   ;;  %s639_s7 = smov %s427_s8 }
  0x5b   : > { %s640_s8 = smov %s509_s20  ;;  %s641_s9 = smov %s435_s10 }
  0x5c   : > { %s642_s10 = smov %s644_s14  ;;  %16 = sbr.rel (!%p14_p6) target bundleno = 6 (0x6), region = 73 }
  0x63   :  { %190 = vsyncpa [#allocation3], 1 }
  0x64   :  { %192 = vsyncpa [#allocation3 + $0x1], 1 }
  0x65   :  { %193 = vsyncpa [#allocation4], 1 }
  0x66   :  { %195 = vsyncpa [#allocation4 + $0x1], 1 }

</bundles_post_ra>
